<compile_context>
chip_gen: v7x
topology: tpu7x:2x2x1
jax: 0.10.0
libtpu: 0.0.40
codegen_flags: <defaults>
</compile_context>

<pallas_src>
import functools
import math

import jax
import jax.numpy as jnp
from jax import lax
from jax.experimental import pallas as pl
from jax.experimental.pallas import tpu as pltpu

_LN_EPS = 1e-5  # nn.LayerNorm default eps


def _layer_norm_f32(x, eps):
    """LayerNorm over the last axis, unit gamma / zero beta, in f32."""
    mean = jnp.mean(x, axis=-1, keepdims=True)
    c = x - mean
    var = jnp.mean(c * c, axis=-1, keepdims=True)
    return c * lax.rsqrt(var + eps)


def _sdpa_kernel(q_ref, k_ref, v_ref, wq_ref, wk_ref, wv_ref, w1_ref, w2_ref,
                 o_ref, *, nb, seq, eps):
    d = q_ref.shape[-1]
    q_in = q_ref[...]                                   # (nb*S, D) f32 -- residual_1

    # --- QKV projections on the flattened (nb*S, D) slab ---------------------
    # bf16 operands on the MXU, f32 accumulation.  1/sqrt(d_model) is folded
    # into Wq by the wrapper; K/V arrive already in bf16.
    qp = jnp.dot(q_in.astype(jnp.bfloat16), wq_ref[...],
                 preferred_element_type=jnp.float32)
    kp = jnp.dot(k_ref[...], wk_ref[...], preferred_element_type=jnp.float32)
    vp = jnp.dot(v_ref[...], wv_ref[...], preferred_element_type=jnp.float32)

    # Batched views for attention: leading-dim-only reshapes (lane dim stays D).
    qp3 = qp.reshape(nb, seq, d).astype(jnp.bfloat16)
    kp3 = kp.reshape(nb, seq, d).astype(jnp.bfloat16)
    vp3 = vp.reshape(nb, seq, d).astype(jnp.bfloat16)

    # --- scores & numerically stable softmax (f32; exp + reciprocal on EUP) --
    scores = jnp.einsum("bqd,bkd->bqk", qp3, kp3,
                        preferred_element_type=jnp.float32)        # (nb, S, S)
    m = jnp.max(scores, axis=-1, keepdims=True)
    e = jnp.exp(scores - m)
    attn = e * pl.reciprocal(jnp.sum(e, axis=-1, keepdims=True), approx=True)

    # --- context = attn @ Vp --------------------------------------------------
    ctx = jnp.einsum("bqk,bkd->bqd", attn.astype(jnp.bfloat16), vp3,
                     preferred_element_type=jnp.float32)           # (nb, S, D)
    ctx = ctx.reshape(nb * seq, d)

    # --- LayerNorm(context + residual_1) --------------------------------------
    x1 = _layer_norm_f32(ctx + q_in, eps)

    # --- position-wise FC: ReLU(x1 @ W1) @ W2 (H padded to 128 lanes) ---------
    h = jnp.maximum(
        jnp.dot(x1.astype(jnp.bfloat16), w1_ref[...],
                preferred_element_type=jnp.float32), 0.0)          # (nb*S, Hp)
    y = jnp.dot(h.astype(jnp.bfloat16), w2_ref[...],
                preferred_element_type=jnp.float32)                # (nb*S, D)

    # --- LayerNorm(y + residual_2) and store ----------------------------------
    o_ref[...] = _layer_norm_f32(y + x1, eps).astype(o_ref.dtype)


@functools.partial(jax.jit, static_argnames=("num_batch_blocks",))
def sdpa_forward(Q, K, V, wq, wk, wv, w1, w2, *, num_batch_blocks=1):
    """Q, K, V: (B, S, D) f32.  Weights pre-transposed to (in, out) layout.

    num_batch_blocks: grid steps over the batch axis.  1 (default) fuses the
    whole batch into a single step (best on v5e/v6e, 1 TensorCore); set to 2 on
    v7x so both TensorCores get a "parallel" grid step.
    """
    B, S, D = Q.shape
    H = w1.shape[1]
    assert B % num_batch_blocks == 0, (B, num_batch_blocks)
    nb = B // num_batch_blocks          # batch elements per grid step
    rows = nb * S                       # flattened M dimension per step

    scale = 1.0 / math.sqrt(D)
    # Fold the 1/sqrt(d_model) score scale into Wq (residual_1 uses raw Q, so safe).
    wq_b = (wq * scale).astype(jnp.bfloat16)
    wk_b = wk.astype(jnp.bfloat16)
    wv_b = wv.astype(jnp.bfloat16)

    # Zero-pad FC hidden dim to a multiple of 128 lanes (ReLU(0)=0; zero rows of
    # W2 contribute nothing) -> unmasked vreg traffic on the (rows, Hp) slab.
    Hp = ((H + 127) // 128) * 128
    w1_b = jnp.zeros((D, Hp), jnp.bfloat16).at[:, :H].set(w1.astype(jnp.bfloat16))
    w2_b = jnp.zeros((Hp, D), jnp.bfloat16).at[:H, :].set(w2.astype(jnp.bfloat16))

    # Flatten (B, S, D) -> (B*S, D) in the wrapper (free metadata reshape).
    Qf = Q.reshape(B * S, D)                            # f32: residual path needs it
    Kb = K.reshape(B * S, D).astype(jnp.bfloat16)       # MXU-only: half the DMA bytes
    Vb = V.reshape(B * S, D).astype(jnp.bfloat16)

    act_spec = pl.BlockSpec((rows, D), lambda i: (i, 0))
    full = lambda shp: pl.BlockSpec(shp, lambda i: (0, 0))

    flops = 2 * B * S * D * (3 * D + 2 * S + 2 * Hp)
    transcendentals = B * S * (S + 3)
    bytes_accessed = (B * S * D * (4 + 2 + 2 + 4)            # Q f32, K/V bf16, out f32
                      + (3 * D * D + 2 * D * Hp) * 2)        # bf16 weights

    kernel = functools.partial(_sdpa_kernel, nb=nb, seq=S, eps=_LN_EPS)

    out = pl.pallas_call(
        kernel,
        out_shape=jax.ShapeDtypeStruct((B * S, D), jnp.float32),
        grid_spec=pltpu.PrefetchScalarGridSpec(
            num_scalar_prefetch=0,
            grid=(num_batch_blocks,),
            in_specs=[
                act_spec, act_spec, act_spec,               # Q (f32), K, V (bf16)
                full((D, D)), full((D, D)), full((D, D)),   # Wq (pre-scaled), Wk, Wv
                full((D, Hp)), full((Hp, D)),               # fc W1 (padded), fc W2 (padded)
            ],
            out_specs=act_spec,
        ),
        compiler_params=pltpu.CompilerParams(
            dimension_semantics=("parallel",)),
        cost_estimate=pl.CostEstimate(
            flops=int(flops),
            transcendentals=int(transcendentals),
            bytes_accessed=int(bytes_accessed)),
    )(Qf, Kb, Vb, wq_b, wk_b, wv_b, w1_b, w2_b)

    return out.reshape(B, S, D)


# ---------------------------------------------------------------------------
# Pure-JAX reference (f32 end-to-end) for a correctness sanity check.
# ---------------------------------------------------------------------------
def _ln_ref(x):
    mean = jnp.mean(x, axis=-1, keepdims=True)
    var = jnp.mean((x - mean) ** 2, axis=-1, keepdims=True)
    return (x - mean) / jnp.sqrt(var + _LN_EPS)


def _reference(Q, K, V, wq, wk, wv, w1, w2):
    D = Q.shape[-1]
    qp, kp, vp = Q @ wq, K @ wk, V @ wv
    scores = jnp.einsum("bqd,bkd->bqk", qp, kp) / math.sqrt(D)
    attn = jax.nn.softmax(scores, axis=-1)
    ctx = jnp.einsum("bqk,bkd->bqd", attn, vp)
    x1 = _ln_ref(ctx + Q)
    y = jax.nn.relu(x1 @ w1) @ w2
    return _ln_ref(y + x1)


if __name__ == "__main__":
    key = jax.random.PRNGKey(0)
    kq, kk, kv, k1, k2, k3, k4, k5 = jax.random.split(key, 8)

    B, S, D, H = 2, 8, 32, 64   # batch, seq, d_model, fc hidden (fixed = 64)

    def linear_weight(k, fan_in, fan_out):
        # PyTorch nn.Linear default init bound, stored pre-transposed (in, out):
        # y = x @ w  ==  torch.nn.Linear(fan_in, fan_out, bias=False) with weight w.T
        bound = 1.0 / math.sqrt(fan_in)
        return jax.random.uniform(k, (fan_in, fan_out), jnp.float32, -bound, bound)

    Q = jax.random.normal(kq, (B, S, D), jnp.float32)
    K = jax.random.normal(kk, (B, S, D), jnp.float32)
    V = jax.random.normal(kv, (B, S, D), jnp.float32)

    wq = linear_weight(k1, D, D)
    wk = linear_weight(k2, D, D)
    wv = linear_weight(k3, D, D)
    w1 = linear_weight(k4, D, H)
    w2 = linear_weight(k5, H, D)

    # Default: single fully-fused grid step (best on v5e/v6e).
    # On v7x pass num_batch_blocks=2 to put one batch block on each TensorCore.
    out = sdpa_forward(Q, K, V, wq, wk, wv, w1, w2)
    out = jax.block_until_ready(out)

    assert out.shape == (B, S, D), out.shape
    assert bool(jnp.all(jnp.isfinite(out)))

    ref = _reference(Q, K, V, wq, wk, wv, w1, w2)
    max_err = float(jnp.max(jnp.abs(out - ref)))
    # bf16 matmul operands + approx reciprocal vs f32 reference => loose tolerance.
    assert max_err < 5e-2, f"max abs error vs reference: {max_err}"

    print("KERNEL_OK")
</pallas_src>

<mosaic_0001>
module attributes {stable_mosaic.version = 11 : i64} {
  func.func @_sdpa_kernel(%arg0: i32, %arg1: memref<16x32xf32, #tpu.memory_space<vmem>>, %arg2: memref<16x32xbf16, #tpu.memory_space<vmem>>, %arg3: memref<16x32xbf16, #tpu.memory_space<vmem>>, %arg4: memref<32x32xbf16, #tpu.memory_space<vmem>>, %arg5: memref<32x32xbf16, #tpu.memory_space<vmem>>, %arg6: memref<32x32xbf16, #tpu.memory_space<vmem>>, %arg7: memref<32x128xbf16, #tpu.memory_space<vmem>>, %arg8: memref<128x32xbf16, #tpu.memory_space<vmem>>, %arg9: memref<16x32xf32, #tpu.memory_space<vmem>>) attributes {dimension_semantics = [#tpu.dimension_semantics<parallel>], iteration_bounds = array<i64: 1>, scalar_prefetch = 0 : i64, scratch_operands = 0 : i64, tpu.core_type = #tpu.core_type<tc>, window_params = [{transform_indices = @transform_0, window_bounds = array<i64: 16, 32>}, {transform_indices = @transform_1, window_bounds = array<i64: 16, 32>}, {transform_indices = @transform_2, window_bounds = array<i64: 16, 32>}, {pipeline_mode = #tpu.pipeline_mode<synchronous>, transform_indices = @transform_3, window_bounds = array<i64: 32, 32>}, {pipeline_mode = #tpu.pipeline_mode<synchronous>, transform_indices = @transform_4, window_bounds = array<i64: 32, 32>}, {pipeline_mode = #tpu.pipeline_mode<synchronous>, transform_indices = @transform_5, window_bounds = array<i64: 32, 32>}, {pipeline_mode = #tpu.pipeline_mode<synchronous>, transform_indices = @transform_6, window_bounds = array<i64: 32, 128>}, {pipeline_mode = #tpu.pipeline_mode<synchronous>, transform_indices = @transform_7, window_bounds = array<i64: 128, 32>}, {transform_indices = @transform_8, window_bounds = array<i64: 16, 32>}]} {
    %c0 = arith.constant 0 : index
    %c0_0 = arith.constant 0 : index
    %0 = vector.load %arg1[%c0, %c0_0] : memref<16x32xf32, #tpu.memory_space<vmem>>, vector<16x32xf32>
    %1 = arith.truncf %0 : vector<16x32xf32> to vector<16x32xbf16>
    %c0_1 = arith.constant 0 : index
    %c0_2 = arith.constant 0 : index
    %2 = vector.load %arg4[%c0_1, %c0_2] : memref<32x32xbf16, #tpu.memory_space<vmem>>, vector<32x32xbf16>
    %cst = arith.constant dense<0.000000e+00> : vector<16x32xf32>
    %3 = tpu.matmul %1, %2, %cst {dimension_numbers = #tpu.dot_dimension_numbers<[1], [0], [0], [1], [0, 0, 1, 1], [], []>} : vector<16x32xbf16>, vector<32x32xbf16>, vector<16x32xf32> -> vector<16x32xf32>
    %c0_3 = arith.constant 0 : index
    %c0_4 = arith.constant 0 : index
    %4 = vector.load %arg2[%c0_3, %c0_4] : memref<16x32xbf16, #tpu.memory_space<vmem>>, vector<16x32xbf16>
    %c0_5 = arith.constant 0 : index
    %c0_6 = arith.constant 0 : index
    %5 = vector.load %arg5[%c0_5, %c0_6] : memref<32x32xbf16, #tpu.memory_space<vmem>>, vector<32x32xbf16>
    %cst_7 = arith.constant dense<0.000000e+00> : vector<16x32xf32>
    %6 = tpu.matmul %4, %5, %cst_7 {dimension_numbers = #tpu.dot_dimension_numbers<[1], [0], [0], [1], [0, 0, 1, 1], [], []>} : vector<16x32xbf16>, vector<32x32xbf16>, vector<16x32xf32> -> vector<16x32xf32>
    %c0_8 = arith.constant 0 : index
    %c0_9 = arith.constant 0 : index
    %7 = vector.load %arg3[%c0_8, %c0_9] : memref<16x32xbf16, #tpu.memory_space<vmem>>, vector<16x32xbf16>
    %c0_10 = arith.constant 0 : index
    %c0_11 = arith.constant 0 : index
    %8 = vector.load %arg6[%c0_10, %c0_11] : memref<32x32xbf16, #tpu.memory_space<vmem>>, vector<32x32xbf16>
    %cst_12 = arith.constant dense<0.000000e+00> : vector<16x32xf32>
    %9 = tpu.matmul %7, %8, %cst_12 {dimension_numbers = #tpu.dot_dimension_numbers<[1], [0], [0], [1], [0, 0, 1, 1], [], []>} : vector<16x32xbf16>, vector<32x32xbf16>, vector<16x32xf32> -> vector<16x32xf32>
    %10 = vector.shape_cast %3 : vector<16x32xf32> to vector<2x8x32xf32>
    %11 = arith.truncf %10 : vector<2x8x32xf32> to vector<2x8x32xbf16>
    %12 = vector.shape_cast %6 : vector<16x32xf32> to vector<2x8x32xf32>
    %13 = arith.truncf %12 : vector<2x8x32xf32> to vector<2x8x32xbf16>
    %14 = vector.shape_cast %9 : vector<16x32xf32> to vector<2x8x32xf32>
    %15 = arith.truncf %14 : vector<2x8x32xf32> to vector<2x8x32xbf16>
    "tpu.trace_start"() <{level = 10 : i32, message = "bqd,bkd->bqk"}> : () -> ()
    %cst_13 = arith.constant dense<0.000000e+00> : vector<2x8x8xf32>
    %16 = tpu.matmul %11, %13, %cst_13 {dimension_numbers = #tpu.dot_dimension_numbers<[2], [2], [1], [1], [0, 0, 0, 1, 1, 1], [0], [0]>} : vector<2x8x32xbf16>, vector<2x8x32xbf16>, vector<2x8x8xf32> -> vector<2x8x8xf32>
    "tpu.trace_stop"() : () -> ()
    %cst_14 = arith.constant dense<0xFF800000> : vector<2x8xf32>
    %17 = vector.multi_reduction <maximumf>, %16, %cst_14 [2] : vector<2x8x8xf32> to vector<2x8xf32>
    %18 = vector.shape_cast %17 : vector<2x8xf32> to vector<2x8x1xf32>
    %19 = vector.broadcast %18 : vector<2x8x1xf32> to vector<2x8x8xf32>
    %20 = arith.subf %16, %19 : vector<2x8x8xf32>
    %21 = math.exp %20 : vector<2x8x8xf32>
    %cst_15 = arith.constant dense<0.000000e+00> : vector<2x8xf32>
    %22 = vector.multi_reduction <add>, %21, %cst_15 [2] : vector<2x8x8xf32> to vector<2x8xf32>
    %23 = vector.shape_cast %22 : vector<2x8xf32> to vector<2x8x1xf32>
    %24 = tpu.reciprocal %23 {approx = true} : vector<2x8x1xf32> -> vector<2x8x1xf32>
    %25 = vector.broadcast %24 : vector<2x8x1xf32> to vector<2x8x8xf32>
    %26 = arith.mulf %21, %25 : vector<2x8x8xf32>
    %27 = arith.truncf %26 : vector<2x8x8xf32> to vector<2x8x8xbf16>
    "tpu.trace_start"() <{level = 10 : i32, message = "bqk,bkd->bqd"}> : () -> ()
    %cst_16 = arith.constant dense<0.000000e+00> : vector<2x8x32xf32>
    %28 = tpu.matmul %27, %15, %cst_16 {dimension_numbers = #tpu.dot_dimension_numbers<[2], [1], [1], [2], [0, 0, 0, 1, 1, 2], [0], [0]>} : vector<2x8x8xbf16>, vector<2x8x32xbf16>, vector<2x8x32xf32> -> vector<2x8x32xf32>
    "tpu.trace_stop"() : () -> ()
    %29 = vector.shape_cast %28 : vector<2x8x32xf32> to vector<16x32xf32>
    %30 = arith.addf %29, %0 : vector<16x32xf32>
    %cst_17 = arith.constant dense<0.000000e+00> : vector<16xf32>
    %31 = vector.multi_reduction <add>, %30, %cst_17 [1] : vector<16x32xf32> to vector<16xf32>
    %32 = vector.shape_cast %31 : vector<16xf32> to vector<16x1xf32>
    %cst_18 = arith.constant 3.200000e+01 : f32
    %33 = vector.broadcast %cst_18 : f32 to vector<16x1xf32>
    %34 = arith.divf %32, %33 : vector<16x1xf32>
    %35 = vector.broadcast %34 : vector<16x1xf32> to vector<16x32xf32>
    %36 = arith.subf %30, %35 : vector<16x32xf32>
    %37 = arith.mulf %36, %36 : vector<16x32xf32>
    %cst_19 = arith.constant dense<0.000000e+00> : vector<16xf32>
    %38 = vector.multi_reduction <add>, %37, %cst_19 [1] : vector<16x32xf32> to vector<16xf32>
    %39 = vector.shape_cast %38 : vector<16xf32> to vector<16x1xf32>
    %cst_20 = arith.constant 3.200000e+01 : f32
    %40 = vector.broadcast %cst_20 : f32 to vector<16x1xf32>
    %41 = arith.divf %39, %40 : vector<16x1xf32>
    %cst_21 = arith.constant 9.99999974E-6 : f32
    %42 = vector.broadcast %cst_21 : f32 to vector<16x1xf32>
    %43 = arith.addf %41, %42 : vector<16x1xf32>
    %44 = math.rsqrt %43 : vector<16x1xf32>
    %45 = vector.broadcast %44 : vector<16x1xf32> to vector<16x32xf32>
    %46 = arith.mulf %36, %45 : vector<16x32xf32>
    %47 = arith.truncf %46 : vector<16x32xf32> to vector<16x32xbf16>
    %c0_22 = arith.constant 0 : index
    %c0_23 = arith.constant 0 : index
    %48 = vector.load %arg7[%c0_22, %c0_23] : memref<32x128xbf16, #tpu.memory_space<vmem>>, vector<32x128xbf16>
    %cst_24 = arith.constant dense<0.000000e+00> : vector<16x128xf32>
    %49 = tpu.matmul %47, %48, %cst_24 {dimension_numbers = #tpu.dot_dimension_numbers<[1], [0], [0], [1], [0, 0, 1, 1], [], []>} : vector<16x32xbf16>, vector<32x128xbf16>, vector<16x128xf32> -> vector<16x128xf32>
    %cst_25 = arith.constant 0.000000e+00 : f32
    %50 = vector.broadcast %cst_25 : f32 to vector<16x128xf32>
    %51 = arith.maximumf %49, %50 : vector<16x128xf32>
    %52 = arith.truncf %51 : vector<16x128xf32> to vector<16x128xbf16>
    %c0_26 = arith.constant 0 : index
    %c0_27 = arith.constant 0 : index
    %53 = vector.load %arg8[%c0_26, %c0_27] : memref<128x32xbf16, #tpu.memory_space<vmem>>, vector<128x32xbf16>
    %cst_28 = arith.constant dense<0.000000e+00> : vector<16x32xf32>
    %54 = tpu.matmul %52, %53, %cst_28 {dimension_numbers = #tpu.dot_dimension_numbers<[1], [0], [0], [1], [0, 0, 1, 1], [], []>} : vector<16x128xbf16>, vector<128x32xbf16>, vector<16x32xf32> -> vector<16x32xf32>
    %55 = arith.addf %54, %46 : vector<16x32xf32>
    %cst_29 = arith.constant dense<0.000000e+00> : vector<16xf32>
    %56 = vector.multi_reduction <add>, %55, %cst_29 [1] : vector<16x32xf32> to vector<16xf32>
    %57 = vector.shape_cast %56 : vector<16xf32> to vector<16x1xf32>
    %cst_30 = arith.constant 3.200000e+01 : f32
    %58 = vector.broadcast %cst_30 : f32 to vector<16x1xf32>
    %59 = arith.divf %57, %58 : vector<16x1xf32>
    %60 = vector.broadcast %59 : vector<16x1xf32> to vector<16x32xf32>
    %61 = arith.subf %55, %60 : vector<16x32xf32>
    %62 = arith.mulf %61, %61 : vector<16x32xf32>
    %cst_31 = arith.constant dense<0.000000e+00> : vector<16xf32>
    %63 = vector.multi_reduction <add>, %62, %cst_31 [1] : vector<16x32xf32> to vector<16xf32>
    %64 = vector.shape_cast %63 : vector<16xf32> to vector<16x1xf32>
    %cst_32 = arith.constant 3.200000e+01 : f32
    %65 = vector.broadcast %cst_32 : f32 to vector<16x1xf32>
    %66 = arith.divf %64, %65 : vector<16x1xf32>
    %cst_33 = arith.constant 9.99999974E-6 : f32
    %67 = vector.broadcast %cst_33 : f32 to vector<16x1xf32>
    %68 = arith.addf %66, %67 : vector<16x1xf32>
    %69 = math.rsqrt %68 : vector<16x1xf32>
    %70 = vector.broadcast %69 : vector<16x1xf32> to vector<16x32xf32>
    %71 = arith.mulf %61, %70 : vector<16x32xf32>
    %c0_34 = arith.constant 0 : index
    %c0_35 = arith.constant 0 : index
    %72 = vector.load %arg9[%c0_34, %c0_35] : memref<16x32xf32, #tpu.memory_space<vmem>>, vector<16x32xf32>
    tpu.vector_store %arg9[%c0_34, %c0_35], %71 {strides = array<i32>} : memref<16x32xf32, #tpu.memory_space<vmem>>, vector<16x32xf32>,
    return
  }
  func.func @transform_0(%arg0: i32) -> (i32, i32) {
    %c0_i32 = arith.constant 0 : i32
    %c0_i32_0 = arith.constant 0 : i32
    return %arg0, %c0_i32 : i32, i32
  }
  func.func @transform_1(%arg0: i32) -> (i32, i32) {
    %c0_i32 = arith.constant 0 : i32
    %c0_i32_0 = arith.constant 0 : i32
    return %arg0, %c0_i32 : i32, i32
  }
  func.func @transform_2(%arg0: i32) -> (i32, i32) {
    %c0_i32 = arith.constant 0 : i32
    %c0_i32_0 = arith.constant 0 : i32
    return %arg0, %c0_i32 : i32, i32
  }
  func.func @transform_3(%arg0: i32) -> (i32, i32) {
    %c0_i32 = arith.constant 0 : i32
    %c0_i32_0 = arith.constant 0 : i32
    %c0_i32_1 = arith.constant 0 : i32
    return %c0_i32, %c0_i32_0 : i32, i32
  }
  func.func @transform_4(%arg0: i32) -> (i32, i32) {
    %c0_i32 = arith.constant 0 : i32
    %c0_i32_0 = arith.constant 0 : i32
    %c0_i32_1 = arith.constant 0 : i32
    return %c0_i32, %c0_i32_0 : i32, i32
  }
  func.func @transform_5(%arg0: i32) -> (i32, i32) {
    %c0_i32 = arith.constant 0 : i32
    %c0_i32_0 = arith.constant 0 : i32
    %c0_i32_1 = arith.constant 0 : i32
    return %c0_i32, %c0_i32_0 : i32, i32
  }
  func.func @transform_6(%arg0: i32) -> (i32, i32) {
    %c0_i32 = arith.constant 0 : i32
    %c0_i32_0 = arith.constant 0 : i32
    %c0_i32_1 = arith.constant 0 : i32
    return %c0_i32, %c0_i32_0 : i32, i32
  }
  func.func @transform_7(%arg0: i32) -> (i32, i32) {
    %c0_i32 = arith.constant 0 : i32
    %c0_i32_0 = arith.constant 0 : i32
    %c0_i32_1 = arith.constant 0 : i32
    return %c0_i32, %c0_i32_0 : i32, i32
  }
  func.func @transform_8(%arg0: i32) -> (i32, i32) {
    %c0_i32 = arith.constant 0 : i32
    %c0_i32_0 = arith.constant 0 : i32
    return %arg0, %c0_i32 : i32, i32
  }
}

</mosaic_0001>

<bundles_post_ra>
// kernel: sdpa_forward.1
= control target key start
LH: loop header
LB: loop body
LE: loop exit
PB: predicated region body
PF: predicated region fallthrough
CT: control target
= control target key end

     0   :  { %v881_v1 = vmov 0.0   ;;  %vm882_vm0 = vmmov 0   ;;  %vm50_vm1 = vcmask 261120   ;;  %s1073_s0 = inlined_call_operand.vmem [shape: f32[16,32], index: 0, kind: input, shape index: {}]   ;;  %s1074_s1 = inlined_call_operand.vmem [shape: bf16[16,32], index: 1, kind: input, shape index: {}]   ;;  %s1075_s2 = inlined_call_operand.vmem [shape: bf16[16,32], index: 2, kind: input, shape index: {}]   ;;  %s1076_s3 = inlined_call_operand.vmem [shape: bf16[32,32], index: 3, kind: input, shape index: {}]   ;;  %s1077_s4 = inlined_call_operand.vmem [shape: bf16[32,32], index: 4, kind: input, shape index: {}]   ;;  %s1078_s5 = inlined_call_operand.vmem [shape: bf16[32,32], index: 5, kind: input, shape index: {}]   ;;  %s1079_s6 = inlined_call_operand.vmem [shape: bf16[32,128], index: 6, kind: input, shape index: {}]   ;;  %s1080_s7 = inlined_call_operand.vmem [shape: bf16[128,32], index: 7, kind: input, shape index: {}]   ;;  %s1081_s8 = inlined_call_operand.hbm [shape: f32[16,32], index: 8, kind: output, shape index: {}]  }
   0x1   :  { %v823_v0 = vld [vmem:[%s1076_s3] sm:$0xff]   ;;  %742 = vmatprep.subr.bf16.mxu1 %v881_v1  ;;  %v824_v2 = vld [vmem:[%s1076_s3 + $0x8] sm:$0xff]   ;;  %772 = vmatprep.subr.bf16.mxu0 %v881_v1 }
   0x2   :  { %743 = vmatpush3.bf16.msra.mxu1 %v823_v0  ;;  %746 = vmatprep.mubr.msk.bf16.mxu1 %vm882_vm0, %v881_v1  ;;  %v944_v3 = vld [vmem:[%s1073_s0] sm:$0xff]  ;;  %v949_v4 = vld [vmem:[%s1073_s0 + $0x8] sm:$0xff] }
   0x3   :  { %744 = vmatprep.subr.bf16.mxu1 %v881_v1  ;;  %774 = vmatprep.mubr.msk.bf16.mxu0 %vm882_vm0, %v881_v1  ;;  %v33_v5 = vpack.c.bf16 %v949_v4, %v944_v3  ;;  %v825_v6 = vld [vmem:[%s1077_s4] sm:$0xff]   ;;  %v826_v7 = vld [vmem:[%s1077_s4 + $0x8] sm:$0xff]  }
   0x4   :  { %v827_v8 = vld [vmem:[%s1074_s1] sm:$0xff]  }
   0x5   :  { %v828_v9 = vld [vmem:[%s1078_s5] sm:$0xff]  }
   0x6   :  { %745 = vmatpush3.bf16.msra.mxu1 %v824_v2 }
   0x7   :  { %750 = vmatprep.subr.bf16.mxu1 %v881_v1 }
   0x9   :  { %747 = vmatmul.mubr.msk.bf16.vlgmr.msra.gmra.mrb[0].mxu1 %vm50_vm1, %v33_v5 }
   0xa   :  { %751 = vmatpush3.bf16.msra.mxu1 %v825_v6  ;;  %754 = vmatprep.mubr.msk.bf16.mxu1 %vm882_vm0, %v881_v1 }
   0xb   :  { %752 = vmatprep.subr.bf16.mxu1 %v881_v1 }
   0xe   :  { %753 = vmatpush3.bf16.msra.mxu1 %v826_v7 }
   0xf   :  { %13 = vsyncpa [#allocation3], 0  ;;  %758 = vmatprep.subr.bf16.mxu1 %v881_v1  ;;  %v829_v10 = vld [vmem:[%s1078_s5 + $0x8] sm:$0xff]   ;;  %v830_v11 = vld [vmem:[%s1075_s2] sm:$0xff]   ;;  %vm355_vm2 = vcmask 1043456   ;;  %vm327_vm3 = vcmask 64512  }
  0x11   :  { %755 = vmatmul.mubr.msk.bf16.vlgmr.msra.gmra.mrb[4].mxu1 %vm50_vm1, %v827_v8 }
  0x12   :  { %759 = vmatpush3.bf16.msra.mxu1 %v828_v9  ;;  %762 = vmatprep.mubr.msk.bf16.mxu1 %vm882_vm0, %v881_v1 }
  0x13   :  { %760 = vmatprep.subr.bf16.mxu1 %v881_v1 }
  0x16   :  { %761 = vmatpush3.bf16.msra.mxu1 %v829_v10 }
  0x17   :  { %766 = vmatprep.subr.bf16.mxu1 %v881_v1 }
  0x19   :  { %763 = vmatmul.mubr.msk.bf16.vlgmr.msra.gmra.mrb[8].mxu1 %vm50_vm1, %v830_v11 }
  0x1a   :  { %768 = vmatprep.mubr.msk.bf16.mxu1 %vm882_vm0, %v881_v1 }
  0xdc   :  { %v88_v12 = vpop.f32.mrb[0].mxu1 }
  0xdd   :  { %v748_v13 = vpop.f32.mrb[1].mxu1  ;;  %v229_v24 = vpack.c.bf16 %v88_v12, %v88_v12 }
  0xde   :  { %v91_v14 = vpop.f32.mrb[2].mxu1 }
  0xdf   :  { %v749_v15 = vpop.f32.mrb[3].mxu1  ;;  %v230_v25 = vpack.c.bf16 %v91_v14, %v91_v14 }
  0xe4   :  { %v155_v16 = vpop.f32.mrb[4].mxu1 }
  0xe5   :  { %v231_v17 = vpack.c.bf16 %v155_v16, %v155_v16  ;;  %v756_v18 = vpop.f32.mrb[5].mxu1 }
  0xe6   :  { %v158_v19 = vpop.f32.mrb[6].mxu1 }
  0xe7   :  { %v239_v20 = vsel %vm50_vm1, %v231_v17, 0  ;;  %v232_v21 = vpack.c.bf16 %v158_v19, %v158_v19  ;;  %v757_v22 = vpop.f32.mrb[7].mxu1 }
  0xe8   :  { %767 = vmatpush3.bf16.xpose.msra.mxu1 %v239_v20  ;;  %v832_v22 = vld [vmem:[%s1079_s6 + $0x8] sm:$0xff]  }
  0xe9   :  { %v285_v23 = vsel %vm50_vm1, %v232_v21, 0  ;;  %778 = vmatprep.subr.bf16.mxu1 %v881_v1 }
  0xea   :  { %773 = vmatpush3.bf16.xpose.msra.mxu0 %v285_v23  ;;  %v833_v23 = vld [vmem:[%s1080_s7] sm:$0xff]  }
  0xeb   :  { %784 = vmatprep.subr.bf16.mxu0 %v881_v1 }
  0xec   :  { %v222_v26 = vpop.f32.mrb[8].mxu1 }
  0xed   :  { %v233_v27 = vpack.c.bf16 %v222_v26, %v222_v26  ;;  %v764_v28 = vpop.f32.mrb[9].mxu1  ;;  %v836_v26 = vld [vmem:[%s1080_s7 + $0x18] sm:$0xff]  }
  0xee   :  { %v225_v29 = vpop.f32.mrb[10].mxu1  ;;  %v838_v28 = vld [vmem:[%s1080_s7 + $0x28] sm:$0xff]  }
  0xef   :  { %769 = vmatmul.mubr.msk.bf16.vlgmr.msra.gmra.mrb[12].mxu1 %vm50_vm1, %v229_v24  ;;  %v357_v30 = vsel %vm355_vm2, %v233_v27, 0  ;;  %v234_v31 = vpack.c.bf16 %v225_v29, %v225_v29  ;;  %v765_v32 = vpop.f32.mrb[11].mxu1  ;;  %v834_v24 = vld [vmem:[%s1080_s7 + $0x8] sm:$0xff]   ;;  %v837_v27 = vld [vmem:[%s1080_s7 + $0x20] sm:$0xff]  }
  0xf0   :  { %780 = vmatprep.mubr.msk.bf16.mxu1 %vm882_vm0, %v881_v1  ;;  %779 = vmatpush3.bf16.msra.mxu1 %v357_v30 }
  0xf1   :  { %775 = vmatmul.mubr.msk.bf16.vlgmr.msra.gmra.mrb[0].mxu0 %vm50_vm1, %v230_v25  ;;  %v403_v33 = vsel %vm355_vm2, %v234_v31, 0  ;;  %790 = vmatprep.subr.bf16.mxu1 %v881_v1  ;;  %v835_v25 = vld [vmem:[%s1080_s7 + $0x10] sm:$0xff]  }
  0xf2   :  { %786 = vmatprep.mubr.msk.bf16.mxu0 %vm882_vm0, %v881_v1  ;;  %785 = vmatpush3.bf16.msra.mxu0 %v403_v33 }
  0xf3   :  { %798 = vmatprep.subr.bf16.mxu0 %v881_v1 }
 0x1c2   :  { %v275_v34 = vpop.f32.mrb[12].mxu1 }
 0x1c3   :  { %v770_v35 = vpop.f32.mrb[13].mxu1  ;;  %v328_v36 = vsel %vm327_vm3, %v275_v34, -inf }
 0x1c4   :  { %v321_v37 = vpop.f32.mrb[0].mxu0  ;;  %329 = vmax.xlane.f32.xlu0 %v328_v36  ;;  %v278_v38 = vpop.f32.mrb[14].mxu1 }
 0x1c5   :  { %v771_v39 = vpop.f32.mrb[15].mxu1  ;;  %v776_v40 = vpop.f32.mrb[1].mxu0  ;;  %v331_v43 = vsel %vm327_vm3, %v321_v37, -inf }
 0x1c6   :  { %v324_v41 = vpop.f32.mrb[2].mxu0  ;;  %v839_v40 = vld [vmem:[%s1080_s7 + $0x30] sm:$0xff]  }
 0x1c7   :  { %v777_v42 = vpop.f32.mrb[3].mxu0  ;;  %v840_v41 = vld [vmem:[%s1080_s7 + $0x38] sm:$0xff]   ;;  %s883_s7 = smov [#allocation2]  }
 0x1c8   :  { %332 = vmax.xlane.f32.xlu0 %v331_v43  ;;  %s676_s15 = sshll.u32 %s883_s7, 4  ;;  %s677_s15 = int_to_ptr.vmem [resolvable:$true] %s676_s15 }
 0x1c9   :  { %s857_s0 = scalar_lea.vmem %s677_s15, 256  ;;  %p862_p1 = scmp.lt.s32.totalorder %s677_s15, %s677_s15 }
 0x1ca   :  { %p858_p0 = scmp.ne.s32.totalorder %s677_s15, %s857_s0  ;;  %p863_p2 = scmp.lt.s32.totalorder %s857_s0, %s857_s0 }
 0x1cc   :  { %p864_p3 = por %p863_p2, %p862_p1 }
 0x1ce   :  { %p865_p4 = pnand %p864_p3, %p858_p0 }
 0x251   :  { %v330_v44 = vpop.xlane.xlu0 %329 }
 0x252   :  { %v334_v45 = vsub.f32 %v275_v34, %v330_v44 }
 0x254   :  { %v336_v46 = vmul.f32 1.442695, %v334_v45 }
 0x255   :  { %v333_v47 = vpop.xlane.xlu0 %332 }
 0x256   :  { %841 = vpow2.f32 %v336_v46  ;;  %v335_v48 = vsub.f32 %v321_v37, %v333_v47 }
 0x258   :  { %v338_v49 = vmul.f32 1.442695, %v335_v48 }
 0x25a   :  { %843 = vpow2.f32 %v338_v49 }
 0x260   :  { %v842_v50 = vpop.eup %841 }
 0x261   :  { %v340_v51 = vsel %vm327_vm3, %v842_v50, 0.0 }
 0x262   :  { %341 = vadd.xlane.f32.xlu1 %v340_v51 }
 0x264   :  { %v844_v52 = vpop.eup %843 }
 0x265   :  { %v343_v53 = vsel %vm327_vm3, %v844_v52, 0.0 }
 0x266   :  { %344 = vadd.xlane.f32.xlu1 %v343_v53 }
 0x2ef   :  { %v342_v54 = vpop.xlane.xlu1 %341 }
 0x2f0   :  { %845 = vrcp.f32 %v342_v54 }
 0x2f3   :  { %v345_v55 = vpop.xlane.xlu1 %344 }
 0x2f4   :  { %847 = vrcp.f32 %v345_v55 }
 0x2fa   :  { %v846_v56 = vpop.eup %845 }
 0x2fb   :  { %v348_v57 = vmul.f32 %v846_v56, %v842_v50 }
 0x2fd   :  { %v350_v58 = vpack.c.bf16 %v348_v57, %v348_v57 }
 0x2fe   :  { %v848_v59 = vpop.eup %847 }
 0x2ff   :  { %v349_v60 = vmul.f32 %v848_v59, %v844_v52  ;;  %781 = vmatmul.mubr.msk.bf16.vlgmr.msra.gmra.mrb[16].mxu1 %vm327_vm3, %v350_v58 }
 0x300   :  { %794 = vmatprep.mubr.msk.bf16.mxu1 %vm882_vm0, %v881_v1 }
 0x301   :  { %v351_v61 = vpack.c.bf16 %v349_v60, %v349_v60 }
 0x303   :  { %787 = vmatmul.mubr.msk.bf16.vlgmr.msra.gmra.mrb[4].mxu0 %vm327_vm3, %v351_v61 }
 0x304   :  { %814 = vmatprep.mubr.msk.bf16.mxu0 %vm882_vm0, %v881_v1  ;;  %799 = vmatpush3.bf16.msra.mxu0 %v833_v23 }
 0x305   :  { %800 = vmatprep.subr.bf16.mxu0 %v881_v1 }
 0x308   :  { %801 = vmatpush3.bf16.msra.mxu0 %v834_v24 }
 0x309   :  { %802 = vmatprep.subr.bf16.mxu0 %v881_v1 }
 0x30c   :  { %803 = vmatpush3.bf16.msra.mxu0 %v835_v25 }
 0x30d   :  { %804 = vmatprep.subr.bf16.mxu0 %v881_v1 }
 0x310   :  { %805 = vmatpush3.bf16.msra.mxu0 %v836_v26 }
 0x311   :  { %806 = vmatprep.subr.bf16.mxu0 %v881_v1 }
 0x314   :  { %807 = vmatpush3.bf16.msra.mxu0 %v837_v27 }
 0x315   :  { %808 = vmatprep.subr.bf16.mxu0 %v881_v1 }
 0x318   :  { %809 = vmatpush3.bf16.msra.mxu0 %v838_v28 }
 0x319   :  { %810 = vmatprep.subr.bf16.mxu0 %v881_v1 }
 0x31c   :  { %811 = vmatpush3.bf16.msra.mxu0 %v839_v40 }
 0x31d   :  { %812 = vmatprep.subr.bf16.mxu0 %v881_v1 }
 0x320   :  { %813 = vmatpush3.bf16.msra.mxu0 %v840_v41 }
 0x3d2   :  { %v393_v62 = vpop.f32.mrb[16].mxu1 }
 0x3d3   :  { %v445_v63 = vadd.f32 %v393_v62, %v944_v3  ;;  %v782_v0 = vpop.f32.mrb[17].mxu1 }
 0x3d4   :  { %v396_v2 = vpop.f32.mrb[18].mxu1 }
 0x3d5   :  { %v783_v5 = vpop.f32.mrb[19].mxu1  ;;  %v447_v6 = vsel %vm50_vm1, %v445_v63, 0.0 }
 0x3d6   :  { %v439_v7 = vpop.f32.mrb[4].mxu0  ;;  %448 = vadd.xlane.f32.xlu0 %v447_v6 }
 0x3d7   :  { %v446_v8 = vadd.f32 %v439_v7, %v949_v4  ;;  %v788_v9 = vpop.f32.mrb[5].mxu0  ;;  %v831_v4 = vld [vmem:[%s1079_s6] sm:$0xff]  }
 0x3d8   :  { %v442_v10 = vpop.f32.mrb[6].mxu0  ;;  %791 = vmatpush3.bf16.msra.mxu1 %v831_v4 }
 0x3d9   :  { %v789_v11 = vpop.f32.mrb[7].mxu0  ;;  %v450_v12 = vsel %vm50_vm1, %v446_v8, 0.0  ;;  %792 = vmatprep.subr.bf16.mxu1 %v881_v1 }
 0x3da   :  { %451 = vadd.xlane.f32.xlu1 %v450_v12 }
 0x3dc   :  { %793 = vmatpush3.bf16.msra.mxu1 %v832_v22 }
 0x463   :  { %v449_v13 = vpop.xlane.xlu0 %448 }
 0x464   :  { %v454_v14 = vmul.f32 0.03125, %v449_v13 }
 0x466   :  { %v456_v15 = vsub.f32 %v445_v63, %v454_v14 }
 0x467   :  { %v452_v16 = vpop.xlane.xlu1 %451 }
 0x468   :  { %v455_v3 = vmul.f32 0.03125, %v452_v16  ;;  %v458_v17 = vmul.f32 %v456_v15, %v456_v15 }
 0x46a   :  { %v457_v18 = vsub.f32 %v446_v8, %v455_v3  ;;  %v460_v19 = vsel %vm50_vm1, %v458_v17, 0.0 }
 0x46b   :  { %461 = vadd.xlane.f32.xlu0 %v460_v19 }
 0x46c   :  { %v459_v20 = vmul.f32 %v457_v18, %v457_v18 }
 0x46e   :  { %v463_v21 = vsel %vm50_vm1, %v459_v20, 0.0 }
 0x46f   :  { %464 = vadd.xlane.f32.xlu1 %v463_v21 }
 0x4f8   :  { %v462_v29 = vpop.xlane.xlu0 %461 }
 0x4f9   :  { %v466_v30 = vmul.f32 0.03125, %v462_v29 }
 0x4fb   :  { %v468_v31 = vadd.f32 1e-05, %v466_v30 }
 0x4fc   :  { %v465_v32 = vpop.xlane.xlu1 %464 }
 0x4fd   :  { %v467_v33 = vmul.f32 0.03125, %v465_v32  ;;  %849 = vrsqrt.f32 %v468_v31 }
 0x4ff   :  { %v469_v34 = vadd.f32 1e-05, %v467_v33 }
 0x501   :  { %851 = vrsqrt.f32 %v469_v34 }
 0x507   :  { %v850_v35 = vpop.eup %849 }
 0x508   :  { %v472_v37 = vmul.f32 %v850_v35, %v456_v15 }
 0x50b   :  { %v852_v36 = vpop.eup %851 }
 0x50c   :  { %v473_v38 = vmul.f32 %v852_v36, %v457_v18 }
 0x50e   :  { %v474_v39 = vpack.c.bf16 %v473_v38, %v472_v37 }
 0x510   :  { %795 = vmatmul.mubr.msk.bf16.vlgmr.msra.gmra.mrb[20].mxu1 %vm50_vm1, %v474_v39 }
 0x5e3   :  { %v528_v42 = vpop.f32.mrb[20].mxu1 }
 0x5e4   :  { %v796_v43 = vpop.f32.mrb[21].mxu1  ;;  %v535_v45 = vmax.f32 %v528_v42, 0.0 }
 0x5e5   :  { %v531_v44 = vpop.f32.mrb[22].mxu1 }
 0x5e6   :  { %v536_v46 = vmax.f32 %v531_v44, 0.0  ;;  %v797_v47 = vpop.f32.mrb[23].mxu1 }
 0x5e8   :  { %v537_v48 = vpack.c.bf16 %v536_v46, %v535_v45 }
 0x5ea   :  { %815 = vmatmul.mubr.bf16.vlgmr.msra.gmra.mrb[8].mxu0 %v537_v48 }
 0x6bd   :  { %v636_v49 = vpop.f32.mrb[8].mxu0 }
 0x6be   :  { %v637_v50 = vadd.f32 %v636_v49, %v472_v37  ;;  %v816_v51 = vpop.f32.mrb[9].mxu0 }
 0x6bf   :  { %v639_v52 = vpop.f32.mrb[10].mxu0 }
 0x6c0   :  { %v640_v53 = vadd.f32 %v639_v52, %v473_v38  ;;  %v817_v54 = vpop.f32.mrb[11].mxu0  ;;  %v643_v1 = vsel %vm50_vm1, %v637_v50, 0.0 }
 0x6c1   :  { %644 = vadd.xlane.f32.xlu0 %v643_v1 }
 0x6c2   :  { %v646_v55 = vsel %vm50_vm1, %v640_v53, 0.0 }
 0x6c3   :  { %647 = vadd.xlane.f32.xlu1 %v646_v55 }
 0x74e   :  { %v645_v56 = vpop.xlane.xlu0 %644 }
 0x74f   :  { %v649_v57 = vmul.f32 0.03125, %v645_v56 }
 0x750   :  { %v648_v58 = vpop.xlane.xlu1 %647 }
 0x751   :  { %v651_v59 = vsub.f32 %v637_v50, %v649_v57  ;;  %v650_v60 = vmul.f32 0.03125, %v648_v58 }
 0x753   :  { %v652_v61 = vsub.f32 %v640_v53, %v650_v60  ;;  %v653_v62 = vmul.f32 %v651_v59, %v651_v59 }
 0x755   :  { %v655_v63 = vsel %vm50_vm1, %v653_v62, 0.0  ;;  %v654_v0 = vmul.f32 %v652_v61, %v652_v61 }
 0x756   :  { %656 = vadd.xlane.f32.xlu0 %v655_v63 }
 0x757   :  { %v658_v2 = vsel %vm50_vm1, %v654_v0, 0.0 }
 0x758   :  { %659 = vadd.xlane.f32.xlu1 %v658_v2 }
 0x7e3   :  { %v657_v5 = vpop.xlane.xlu0 %656 }
 0x7e4   :  { %v661_v6 = vmul.f32 0.03125, %v657_v5 }
 0x7e5   :  { %v660_v7 = vpop.xlane.xlu1 %659 }
 0x7e6   :  { %v663_v8 = vadd.f32 1e-05, %v661_v6  ;;  %v662_v9 = vmul.f32 0.03125, %v660_v7 }
 0x7e8   :  { %853 = vrsqrt.f32 %v663_v8  ;;  %v664_v10 = vadd.f32 1e-05, %v662_v9 }
 0x7ea   :  { %855 = vrsqrt.f32 %v664_v10 }
 0x7f2   :  { %v854_v11 = vpop.eup %853 }
 0x7f3   :  { %v667_v12 = vmul.f32 %v854_v11, %v651_v59 }
 0x7f4   :  { %v856_v13 = vpop.eup %855 }
 0x7f5   :  { %v668_v14 = vmul.f32 %v856_v13, %v652_v61  ;;  %669 = vst.msk [vmem:[#allocation2] sm:$0xff] %vm50_vm1, %v667_v12 }
 0x7f7   :  { %670 = vst.msk [vmem:[#allocation2 + $0x8] sm:$0xff] %vm50_vm1, %v668_v14 }
 0x7f8   :  { %868 = shalt.err (!%p865_p4)
}
 0x7f9   :  { %s869_s18 = scalar_lea.hbm %s1081_s8, 256 }
 0x7fa   :  { %p870_p5 = scmp.ne.s32.totalorder %s1081_s8, %s869_s18  ;;  %p873_p6 = scmp.lt.u32.totalorder %s869_s18, %s1081_s8 }
 0x7fc   :  { %p875_p7 = pnand %p873_p6, %p870_p5 }
 0x7fe   :  { %878 = shalt.err (!%p875_p7)
}
 0x7ff   :  { %s884_s2 = smov 128   ;;  %s885_s5 = smov 8  }
 0x800   :  { %682 = dma.vmem_to_hbm [thread:$0]  %s677_s15, 256, %s1081_s8, [#allocation3], %s884_s2, %s884_s2, %s885_s5  }
 0x801   :  { %879 = dma.done.wait [#allocation3], 256  }
 0x802   :  { %880 = vsyncadd [#allocation3], 4294967040 }
 0x803   :  { %686 = vsyncpa [#allocation3], 1 }

</bundles_post_ra>
